<compile_context>
chip_gen: v6e
topology: v6e:2x2x1
jax: 0.10.0
libtpu: 0.0.40
codegen_flags: <defaults>
</compile_context>

<pallas_src>
import jax
import jax.numpy as jnp
from jax.experimental import pallas as pl
from jax.experimental.pallas import tpu as pltpu

LANE = 128


def _round_up(x, m):
    return ((x + m - 1) // m) * m


def _vmem_capacity_bytes():
    """Physical VMEM of this TPU generation; conservative fallback (v7x) if unknown."""
    try:
        cap = getattr(pltpu.get_tpu_info(), "vmem_capacity_bytes", None)
        if cap:
            return int(cap)
    except Exception:
        pass
    return 64 * 2**20


def _default_row_tile(vmem_cap):
    # 128-MiB parts (v5e/v6e): bigger A row tiles -> fewer grid steps, longer DMAs.
    # 64-MiB parts (v7x): keep TM moderate, leave headroom.
    return 512 if vmem_cap >= 100 * 2**20 else 256


# ----------------------------------------------------------------------------
# Graph / parameter preparation (hoisted out of the per-forward path).
# ----------------------------------------------------------------------------

def prepare_graph(edge_indices, x_stack, *, row_tile=None):
    """Build padded int8 edge-count adjacency, f32 deg_inv and bf16 features once.

    edge_indices: [T, 2, E] int32, x_stack: [T, N, F] f32.
    """
    T, N, F = x_stack.shape
    vmem_cap = _vmem_capacity_bytes()
    if row_tile is None:
        row_tile = _default_row_tile(vmem_cap)
    if N > row_tile:
        n_pad, tm = _round_up(N, row_tile), row_tile
    else:
        n_pad = _round_up(N, LANE)
        tm = n_pad
    f_pad = _round_up(F, LANE)

    def one(ei):
        src, dst = ei[0], ei[1]
        # Edge multiplicities (assumed < 128 so they fit int8 exactly).
        cnt = jnp.zeros((n_pad, n_pad), jnp.int32).at[dst, src].add(1)
        deg = cnt.sum(axis=1, keepdims=True).astype(jnp.float32)
        deg_inv = 1.0 / jnp.maximum(deg, 1.0)      # padded / isolated rows -> 1.0
        return cnt.astype(jnp.int8), deg_inv

    a_i8, deg_inv = jax.vmap(one)(edge_indices)     # (T, Np, Np) i8, (T, Np, 1) f32
    x_p = (jnp.zeros((T, n_pad, f_pad), jnp.bfloat16)
           .at[:, :N, :F].set(x_stack.astype(jnp.bfloat16)))
    return dict(a=a_i8, deg_inv=deg_inv, x=x_p, n=N, f=F,
                row_tile=tm, vmem_cap=vmem_cap)


def prepare_params(params, in_dim, hidden):
    """Zero-pad feature/hidden dims to 128 lanes and cast weights to bf16 (once)."""
    f_pad, h_pad = _round_up(in_dim, LANE), _round_up(hidden, LANE)

    def pad_w(w, fin, fin_p):
        return (jnp.zeros((fin_p, h_pad), jnp.float32)
                .at[:fin, :hidden].set(w).astype(jnp.bfloat16))

    def pad_b(b):
        return jnp.zeros((1, h_pad), jnp.float32).at[:, :hidden].set(b.reshape(1, hidden))

    return dict(
        w1l=pad_w(params["w1l"], in_dim, f_pad), w1r=pad_w(params["w1r"], in_dim, f_pad),
        b1=pad_b(params["b1"]),
        w2l=pad_w(params["w2l"], hidden, h_pad), w2r=pad_w(params["w2r"], hidden, h_pad),
        b2=pad_b(params["b2"]),
        h=hidden,
    )


# ----------------------------------------------------------------------------
# Fused both-layers kernel (A resident per snapshot, h1 in VMEM scratch).
# ----------------------------------------------------------------------------

def _fused_kernel(a_ref, dinv_ref, x_ref, w1l_ref, w1r_ref, b1_ref,
                  w2l_ref, w2r_ref, b2_ref, out_ref, h1_ref):
    bf16 = jnp.bfloat16
    a = a_ref[...].astype(bf16)          # exact small-integer counts -> bf16 (VPU cast)
    dinv = dinv_ref[...]                 # (Np, 1) f32
    x = x_ref[...]                       # (Np, Fp) bf16

    # Layer 1: mean aggregation (f32 accumulate, f32 rescale) + two accumulating dots.
    agg1 = dinv * jnp.dot(a, x, preferred_element_type=jnp.float32)
    h1 = (jnp.dot(agg1.astype(bf16), w1l_ref[...], preferred_element_type=jnp.float32)
          + jnp.dot(x, w1r_ref[...], preferred_element_type=jnp.float32)
          + b1_ref[...])
    # dropout(p=0.2) is identity in inference mode (forward(no_grad=True)).
    h1_ref[...] = jnp.maximum(h1, 0.0).astype(bf16)
    h1b = h1_ref[...]

    # Layer 2 (no ReLU): A stays resident -> only one HBM read of A per snapshot.
    agg2 = dinv * jnp.dot(a, h1b, preferred_element_type=jnp.float32)
    out_ref[...] = (jnp.dot(agg2.astype(bf16), w2l_ref[...], preferred_element_type=jnp.float32)
                    + jnp.dot(h1b, w2r_ref[...], preferred_element_type=jnp.float32)
                    + b2_ref[...])


def _fused_vmem_bytes(n_p, f_p, h_p):
    a_i8 = n_p * n_p
    dinv = n_p * 4
    x = n_p * f_p * 2
    w = 2 * (f_p * h_p + h_p * h_p) * 2
    b = 2 * h_p * 4
    out = n_p * h_p * 4
    pipelined = 2 * (a_i8 + dinv + x + w + b + out)   # pallas double buffers
    a_bf16 = 2 * n_p * n_p                            # in-kernel cast temp
    h1 = n_p * h_p * 2                                # scratch
    f32_tmp = 2 * n_p * max(f_p, h_p) * 4             # agg / pre-cast temps
    return pipelined + a_bf16 + h1 + f32_tmp


def _fused_forward(a, dinv, x, p, vmem_budget):
    T, n_p, _ = a.shape
    f_p = x.shape[-1]
    h_p = p["w1l"].shape[1]
    est = _fused_vmem_bytes(n_p, f_p, h_p)
    vmem_limit = int(min(max(int(1.25 * est), 16 * 2**20), vmem_budget))
    return pl.pallas_call(
        _fused_kernel,
        out_shape=jax.ShapeDtypeStruct((T, n_p, h_p), jnp.float32),
        grid_spec=pltpu.PrefetchScalarGridSpec(
            num_scalar_prefetch=0,
            grid=(T,),
            in_specs=[
                pl.BlockSpec((None, n_p, n_p), lambda t: (t, 0, 0)),   # A counts (i8)
                pl.BlockSpec((None, n_p, 1), lambda t: (t, 0, 0)),     # deg_inv (f32)
                pl.BlockSpec((None, n_p, f_p), lambda t: (t, 0, 0)),   # X (bf16)
                pl.BlockSpec((f_p, h_p), lambda t: (0, 0)),            # W1_l
                pl.BlockSpec((f_p, h_p), lambda t: (0, 0)),            # W1_r
                pl.BlockSpec((1, h_p), lambda t: (0, 0)),              # b1
                pl.BlockSpec((h_p, h_p), lambda t: (0, 0)),            # W2_l
                pl.BlockSpec((h_p, h_p), lambda t: (0, 0)),            # W2_r
                pl.BlockSpec((1, h_p), lambda t: (0, 0)),              # b2
            ],
            out_specs=pl.BlockSpec((None, n_p, h_p), lambda t: (t, 0, 0)),
            scratch_shapes=[pltpu.VMEM((n_p, h_p), jnp.bfloat16)],     # h1
        ),
        compiler_params=pltpu.CompilerParams(
            dimension_semantics=("parallel",),
            vmem_limit_bytes=vmem_limit),
    )(a, dinv, x, p["w1l"], p["w1r"], p["b1"], p["w2l"], p["w2r"], p["b2"])


# ----------------------------------------------------------------------------
# Row-tiled streaming path (large graphs): one generic fused-layer kernel, 2 calls.
# ----------------------------------------------------------------------------

def _make_layer_kernel(tm, apply_relu):
    def kernel(a_ref, dinv_ref, x_ref, wl_ref, wr_ref, b_ref, out_ref):
        bf16 = jnp.bfloat16
        i = pl.program_id(1)
        # Mean-aggregated neighbour features for this row tile (f32 accumulate,
        # exact i8 counts rescaled by f32 deg_inv on the VPU).
        agg = dinv_ref[...] * jnp.dot(a_ref[...].astype(bf16), x_ref[...],
                                      preferred_element_type=jnp.float32)
        # Root (self) features for the same rows, sliced from the resident X.
        start = pl.multiple_of(i * tm, tm)
        x_tile = x_ref[pl.ds(start, tm), :]
        # Two accumulating dots (no lane-axis concat / packed-LHS copy).
        out = (jnp.dot(agg.astype(bf16), wl_ref[...], preferred_element_type=jnp.float32)
               + jnp.dot(x_tile, wr_ref[...], preferred_element_type=jnp.float32)
               + b_ref[...])
        if apply_relu:
            out = jnp.maximum(out, 0.0)
        out_ref[...] = out.astype(out_ref.dtype)
    return kernel


def _layer_vmem_bytes(tm, n_p, fin_p, h_p, out_itemsize):
    a_i8 = tm * n_p
    dinv = tm * 4
    x = n_p * fin_p * 2
    w = 2 * fin_p * h_p * 2
    b = h_p * 4
    out = tm * h_p * out_itemsize
    pipelined = 2 * (a_i8 + dinv + x + w + b + out)
    a_bf16 = tm * n_p * 2
    f32_tmp = 2 * tm * max(fin_p, h_p) * 4
    return pipelined + a_bf16 + f32_tmp


def _stream_layer(a, dinv, x_in, wl, wr, b, tm, apply_relu, out_dtype, vmem_budget):
    T, n_p, _ = a.shape
    fin_p = x_in.shape[-1]
    h_p = wl.shape[1]
    est = _layer_vmem_bytes(tm, n_p, fin_p, h_p, jnp.dtype(out_dtype).itemsize)
    vmem_limit = int(min(max(int(1.25 * est), 16 * 2**20), vmem_budget))
    return pl.pallas_call(
        _make_layer_kernel(tm, apply_relu),
        out_shape=jax.ShapeDtypeStruct((T, n_p, h_p), out_dtype),
        grid_spec=pltpu.PrefetchScalarGridSpec(
            num_scalar_prefetch=0,
            grid=(T, n_p // tm),
            in_specs=[
                # A row tile (int8, streamed per grid step).
                pl.BlockSpec((None, tm, n_p), lambda t, i: (t, i, 0)),
                # Matching deg_inv rows (f32, tiny).
                pl.BlockSpec((None, tm, 1), lambda t, i: (t, i, 0)),
                # Full feature matrix for snapshot t (resident across row tiles).
                pl.BlockSpec((None, n_p, fin_p), lambda t, i: (t, 0, 0)),
                # W_l / W_r / bias (resident across the whole grid, tiny).
                pl.BlockSpec((fin_p, h_p), lambda t, i: (0, 0)),
                pl.BlockSpec((fin_p, h_p), lambda t, i: (0, 0)),
                pl.BlockSpec((1, h_p), lambda t, i: (0, 0)),
            ],
            out_specs=pl.BlockSpec((None, tm, h_p), lambda t, i: (t, i, 0)),
        ),
        compiler_params=pltpu.CompilerParams(
            dimension_semantics=("parallel", "parallel"),
            vmem_limit_bytes=vmem_limit),
    )(a, dinv, x_in, wl, wr, b)


# ----------------------------------------------------------------------------
# Forward.
# ----------------------------------------------------------------------------

def euler_gnn_forward(graph, pparams, *, force_streamed=False):
    """graph from prepare_graph, pparams from prepare_params -> [T, N, H] f32."""
    a, dinv, x = graph["a"], graph["deg_inv"], graph["x"]
    T, n_p, _ = a.shape
    h_p = pparams["w1l"].shape[1]
    f_p = x.shape[-1]
    N, H = graph["n"], pparams["h"]
    tm = graph["row_tile"]
    # ~92 MiB budget on 128-MiB parts (v5e/v6e), ~46 MiB on 64-MiB v7x.
    vmem_budget = max(int(0.72 * graph["vmem_cap"]), 32 * 2**20)

    use_fused = (not force_streamed) and \
        (int(1.2 * _fused_vmem_bytes(n_p, f_p, h_p)) <= vmem_budget)

    if use_fused:
        out = _fused_forward(a, dinv, x, pparams, vmem_budget)
    else:
        # Layer 1 (+ReLU) -> bf16 activations (h1 round-trips HBM as bf16);
        # layer 2 -> f32 output.  Padded h1 rows equal relu(b1) (nonzero) but A's
        # padded columns are zero and padded output rows are sliced off below.
        h1 = _stream_layer(a, dinv, x, pparams["w1l"], pparams["w1r"], pparams["b1"],
                           tm, True, jnp.bfloat16, vmem_budget)
        out = _stream_layer(a, dinv, h1, pparams["w2l"], pparams["w2r"], pparams["b2"],
                            tm, False, jnp.float32, vmem_budget)
    return out[:, :N, :H]


def reference_forward(edge_indices, x_stack, params):
    """Pure-JAX f32 reference of the original module math (for correctness check)."""
    T, N, _ = x_stack.shape

    def one(ei, x):
        a = jnp.zeros((N, N), jnp.float32).at[ei[1], ei[0]].add(1.0)
        a = a / jnp.maximum(a.sum(axis=1, keepdims=True), 1.0)
        h1 = jnp.maximum(a @ x @ params["w1l"] + x @ params["w1r"] + params["b1"], 0.0)
        return a @ h1 @ params["w2l"] + h1 @ params["w2r"] + params["b2"]

    return jax.vmap(one)(edge_indices, x_stack)


if __name__ == "__main__":
    # Small, module-consistent shapes: T snapshots, N nodes, in_dim features.
    T, N, IN_DIM, HIDDEN, E = 3, 32, 8, 64, 64

    key = jax.random.PRNGKey(0)
    k_x, k_e, k_w1l, k_w1r, k_w2l, k_w2r, k_b1, k_b2 = jax.random.split(key, 8)

    # Node features per snapshot (stand-in for topological_features output).
    x_stack = jax.random.normal(k_x, (T, N, IN_DIM), jnp.float32)
    # Random edge indices per snapshot.
    edge_indices = jax.random.randint(k_e, (T, 2, E), 0, N)

    # Deterministic parameter init (SAGEConv lin_l has bias, lin_r does not).
    # Weights stored pre-transposed so the kernel computes x @ W directly.
    def init(k, fan_in, fan_out):
        s = 1.0 / jnp.sqrt(jnp.float32(fan_in))
        return jax.random.uniform(k, (fan_in, fan_out), jnp.float32, -s, s)

    params = {
        "w1l": init(k_w1l, IN_DIM, HIDDEN),
        "w1r": init(k_w1r, IN_DIM, HIDDEN),
        "b1": jax.random.uniform(k_b1, (1, HIDDEN), jnp.float32, -0.1, 0.1),
        "w2l": init(k_w2l, HIDDEN, HIDDEN),
        "w2r": init(k_w2r, HIDDEN, HIDDEN),
        "b2": jax.random.uniform(k_b2, (1, HIDDEN), jnp.float32, -0.1, 0.1),
    }

    # One-time preparation (graph-construction time), hoisted out of forward.
    graph = prepare_graph(edge_indices, x_stack)
    pparams = prepare_params(params, IN_DIM, HIDDEN)

    ref = reference_forward(edge_indices, x_stack, params)

    # Fused small-graph path (used automatically at this size).
    out_fused = jax.block_until_ready(euler_gnn_forward(graph, pparams))
    assert out_fused.shape == (T, N, HIDDEN)
    err_f = float(jnp.max(jnp.abs(out_fused - ref)))
    assert jnp.allclose(out_fused, ref, atol=5e-2, rtol=5e-2), err_f

    # Row-tiled streaming path (large-graph fallback), exercised explicitly.
    out_stream = jax.block_until_ready(
        euler_gnn_forward(graph, pparams, force_streamed=True))
    assert out_stream.shape == (T, N, HIDDEN)
    err_s = float(jnp.max(jnp.abs(out_stream - ref)))
    assert jnp.allclose(out_stream, ref, atol=5e-2, rtol=5e-2), err_s

    # TODO(synk): predict()/loss() (edge scoring with randint negatives, unique
    # edges, BCE) are data-dependent gather paths not part of forward(); omitted.
    print("KERNEL_OK")
</pallas_src>

<mosaic_0001>
module attributes {stable_mosaic.version = 11 : i64} {
  func.func @_fused_kernel(%arg0: i32, %arg1: memref<1x128x128xi8, #tpu.memory_space<vmem>>, %arg2: memref<1x128x1xf32, #tpu.memory_space<vmem>>, %arg3: memref<1x128x128xbf16, #tpu.memory_space<vmem>>, %arg4: memref<128x128xbf16, #tpu.memory_space<vmem>>, %arg5: memref<128x128xbf16, #tpu.memory_space<vmem>>, %arg6: memref<1x128xf32, #tpu.memory_space<vmem>>, %arg7: memref<128x128xbf16, #tpu.memory_space<vmem>>, %arg8: memref<128x128xbf16, #tpu.memory_space<vmem>>, %arg9: memref<1x128xf32, #tpu.memory_space<vmem>>, %arg10: memref<1x128x128xf32, #tpu.memory_space<vmem>>, %arg11: memref<128x128xbf16, #tpu.memory_space<vmem>>) attributes {dimension_semantics = [#tpu.dimension_semantics<parallel>], iteration_bounds = array<i64: 3>, scalar_prefetch = 0 : i64, scratch_operands = 1 : i64, tpu.core_type = #tpu.core_type<tc>, window_params = [{transform_indices = @transform_0, window_bounds = array<i64: 1, 128, 128>}, {transform_indices = @transform_1, window_bounds = array<i64: 1, 128, 1>}, {transform_indices = @transform_2, window_bounds = array<i64: 1, 128, 128>}, {pipeline_mode = #tpu.pipeline_mode<synchronous>, transform_indices = @transform_3, window_bounds = array<i64: 128, 128>}, {pipeline_mode = #tpu.pipeline_mode<synchronous>, transform_indices = @transform_4, window_bounds = array<i64: 128, 128>}, {pipeline_mode = #tpu.pipeline_mode<synchronous>, transform_indices = @transform_5, window_bounds = array<i64: 1, 128>}, {pipeline_mode = #tpu.pipeline_mode<synchronous>, transform_indices = @transform_6, window_bounds = array<i64: 128, 128>}, {pipeline_mode = #tpu.pipeline_mode<synchronous>, transform_indices = @transform_7, window_bounds = array<i64: 128, 128>}, {pipeline_mode = #tpu.pipeline_mode<synchronous>, transform_indices = @transform_8, window_bounds = array<i64: 1, 128>}, {transform_indices = @transform_9, window_bounds = array<i64: 1, 128, 128>}]} {
    %c0 = arith.constant 0 : index
    %c0_0 = arith.constant 0 : index
    %c0_1 = arith.constant 0 : index
    %0 = vector.load %arg1[%c0, %c0_0, %c0_1] : memref<1x128x128xi8, #tpu.memory_space<vmem>>, vector<1x128x128xi8>
    %1 = vector.shape_cast %0 : vector<1x128x128xi8> to vector<128x128xi8>
    %2 = arith.sitofp %1 : vector<128x128xi8> to vector<128x128xbf16>
    %c0_2 = arith.constant 0 : index
    %c0_3 = arith.constant 0 : index
    %c0_4 = arith.constant 0 : index
    %3 = vector.load %arg2[%c0_2, %c0_3, %c0_4] : memref<1x128x1xf32, #tpu.memory_space<vmem>>, vector<1x128x1xf32>
    %4 = vector.shape_cast %3 : vector<1x128x1xf32> to vector<128x1xf32>
    %c0_5 = arith.constant 0 : index
    %c0_6 = arith.constant 0 : index
    %c0_7 = arith.constant 0 : index
    %5 = vector.load %arg3[%c0_5, %c0_6, %c0_7] : memref<1x128x128xbf16, #tpu.memory_space<vmem>>, vector<1x128x128xbf16>
    %6 = vector.shape_cast %5 : vector<1x128x128xbf16> to vector<128x128xbf16>
    %cst = arith.constant dense<0.000000e+00> : vector<128x128xf32>
    %7 = tpu.matmul %2, %6, %cst {dimension_numbers = #tpu.dot_dimension_numbers<[1], [0], [0], [1], [0, 0, 1, 1], [], []>} : vector<128x128xbf16>, vector<128x128xbf16>, vector<128x128xf32> -> vector<128x128xf32>
    %8 = vector.broadcast %4 : vector<128x1xf32> to vector<128x128xf32>
    %9 = arith.mulf %8, %7 : vector<128x128xf32>
    %10 = arith.truncf %9 : vector<128x128xf32> to vector<128x128xbf16>
    %c0_8 = arith.constant 0 : index
    %c0_9 = arith.constant 0 : index
    %11 = vector.load %arg4[%c0_8, %c0_9] : memref<128x128xbf16, #tpu.memory_space<vmem>>, vector<128x128xbf16>
    %cst_10 = arith.constant dense<0.000000e+00> : vector<128x128xf32>
    %12 = tpu.matmul %10, %11, %cst_10 {dimension_numbers = #tpu.dot_dimension_numbers<[1], [0], [0], [1], [0, 0, 1, 1], [], []>} : vector<128x128xbf16>, vector<128x128xbf16>, vector<128x128xf32> -> vector<128x128xf32>
    %c0_11 = arith.constant 0 : index
    %c0_12 = arith.constant 0 : index
    %13 = vector.load %arg5[%c0_11, %c0_12] : memref<128x128xbf16, #tpu.memory_space<vmem>>, vector<128x128xbf16>
    %cst_13 = arith.constant dense<0.000000e+00> : vector<128x128xf32>
    %14 = tpu.matmul %6, %13, %cst_13 {dimension_numbers = #tpu.dot_dimension_numbers<[1], [0], [0], [1], [0, 0, 1, 1], [], []>} : vector<128x128xbf16>, vector<128x128xbf16>, vector<128x128xf32> -> vector<128x128xf32>
    %15 = arith.addf %12, %14 : vector<128x128xf32>
    %c0_14 = arith.constant 0 : index
    %c0_15 = arith.constant 0 : index
    %16 = vector.load %arg6[%c0_14, %c0_15] : memref<1x128xf32, #tpu.memory_space<vmem>>, vector<1x128xf32>
    %17 = vector.broadcast %16 : vector<1x128xf32> to vector<128x128xf32>
    %18 = arith.addf %15, %17 : vector<128x128xf32>
    %cst_16 = arith.constant 0.000000e+00 : f32
    %19 = vector.broadcast %cst_16 : f32 to vector<128x128xf32>
    %20 = arith.maximumf %18, %19 : vector<128x128xf32>
    %21 = arith.truncf %20 : vector<128x128xf32> to vector<128x128xbf16>
    %c0_17 = arith.constant 0 : index
    %c0_18 = arith.constant 0 : index
    %22 = vector.load %arg11[%c0_17, %c0_18] : memref<128x128xbf16, #tpu.memory_space<vmem>>, vector<128x128xbf16>
    tpu.vector_store %arg11[%c0_17, %c0_18], %21 {strides = array<i32>} : memref<128x128xbf16, #tpu.memory_space<vmem>>, vector<128x128xbf16>,
    %c0_19 = arith.constant 0 : index
    %c0_20 = arith.constant 0 : index
    %23 = vector.load %arg11[%c0_19, %c0_20] : memref<128x128xbf16, #tpu.memory_space<vmem>>, vector<128x128xbf16>
    %cst_21 = arith.constant dense<0.000000e+00> : vector<128x128xf32>
    %24 = tpu.matmul %2, %23, %cst_21 {dimension_numbers = #tpu.dot_dimension_numbers<[1], [0], [0], [1], [0, 0, 1, 1], [], []>} : vector<128x128xbf16>, vector<128x128xbf16>, vector<128x128xf32> -> vector<128x128xf32>
    %25 = vector.broadcast %4 : vector<128x1xf32> to vector<128x128xf32>
    %26 = arith.mulf %25, %24 : vector<128x128xf32>
    %27 = arith.truncf %26 : vector<128x128xf32> to vector<128x128xbf16>
    %c0_22 = arith.constant 0 : index
    %c0_23 = arith.constant 0 : index
    %28 = vector.load %arg7[%c0_22, %c0_23] : memref<128x128xbf16, #tpu.memory_space<vmem>>, vector<128x128xbf16>
    %cst_24 = arith.constant dense<0.000000e+00> : vector<128x128xf32>
    %29 = tpu.matmul %27, %28, %cst_24 {dimension_numbers = #tpu.dot_dimension_numbers<[1], [0], [0], [1], [0, 0, 1, 1], [], []>} : vector<128x128xbf16>, vector<128x128xbf16>, vector<128x128xf32> -> vector<128x128xf32>
    %c0_25 = arith.constant 0 : index
    %c0_26 = arith.constant 0 : index
    %30 = vector.load %arg8[%c0_25, %c0_26] : memref<128x128xbf16, #tpu.memory_space<vmem>>, vector<128x128xbf16>
    %cst_27 = arith.constant dense<0.000000e+00> : vector<128x128xf32>
    %31 = tpu.matmul %23, %30, %cst_27 {dimension_numbers = #tpu.dot_dimension_numbers<[1], [0], [0], [1], [0, 0, 1, 1], [], []>} : vector<128x128xbf16>, vector<128x128xbf16>, vector<128x128xf32> -> vector<128x128xf32>
    %32 = arith.addf %29, %31 : vector<128x128xf32>
    %c0_28 = arith.constant 0 : index
    %c0_29 = arith.constant 0 : index
    %33 = vector.load %arg9[%c0_28, %c0_29] : memref<1x128xf32, #tpu.memory_space<vmem>>, vector<1x128xf32>
    %34 = vector.broadcast %33 : vector<1x128xf32> to vector<128x128xf32>
    %35 = arith.addf %32, %34 : vector<128x128xf32>
    %c0_30 = arith.constant 0 : index
    %c0_31 = arith.constant 0 : index
    %c0_32 = arith.constant 0 : index
    %36 = vector.load %arg10[%c0_30, %c0_31, %c0_32] : memref<1x128x128xf32, #tpu.memory_space<vmem>>, vector<1x128x128xf32>
    %37 = vector.shape_cast %36 : vector<1x128x128xf32> to vector<128x128xf32>
    %38 = vector.shape_cast %35 : vector<128x128xf32> to vector<1x128x128xf32>
    tpu.vector_store %arg10[%c0_30, %c0_31, %c0_32], %38 {strides = array<i32>} : memref<1x128x128xf32, #tpu.memory_space<vmem>>, vector<1x128x128xf32>,
    return
  }
  func.func @transform_0(%arg0: i32) -> (i32, i32, i32) {
    %c0_i32 = arith.constant 0 : i32
    %c0_i32_0 = arith.constant 0 : i32
    %c0_i32_1 = arith.constant 0 : i32
    return %arg0, %c0_i32, %c0_i32_0 : i32, i32, i32
  }
  func.func @transform_1(%arg0: i32) -> (i32, i32, i32) {
    %c0_i32 = arith.constant 0 : i32
    %c0_i32_0 = arith.constant 0 : i32
    %c0_i32_1 = arith.constant 0 : i32
    return %arg0, %c0_i32, %c0_i32_0 : i32, i32, i32
  }
  func.func @transform_2(%arg0: i32) -> (i32, i32, i32) {
    %c0_i32 = arith.constant 0 : i32
    %c0_i32_0 = arith.constant 0 : i32
    %c0_i32_1 = arith.constant 0 : i32
    return %arg0, %c0_i32, %c0_i32_0 : i32, i32, i32
  }
  func.func @transform_3(%arg0: i32) -> (i32, i32) {
    %c0_i32 = arith.constant 0 : i32
    %c0_i32_0 = arith.constant 0 : i32
    %c0_i32_1 = arith.constant 0 : i32
    return %c0_i32, %c0_i32_0 : i32, i32
  }
  func.func @transform_4(%arg0: i32) -> (i32, i32) {
    %c0_i32 = arith.constant 0 : i32
    %c0_i32_0 = arith.constant 0 : i32
    %c0_i32_1 = arith.constant 0 : i32
    return %c0_i32, %c0_i32_0 : i32, i32
  }
  func.func @transform_5(%arg0: i32) -> (i32, i32) {
    %c0_i32 = arith.constant 0 : i32
    %c0_i32_0 = arith.constant 0 : i32
    %c0_i32_1 = arith.constant 0 : i32
    return %c0_i32, %c0_i32_0 : i32, i32
  }
  func.func @transform_6(%arg0: i32) -> (i32, i32) {
    %c0_i32 = arith.constant 0 : i32
    %c0_i32_0 = arith.constant 0 : i32
    %c0_i32_1 = arith.constant 0 : i32
    return %c0_i32, %c0_i32_0 : i32, i32
  }
  func.func @transform_7(%arg0: i32) -> (i32, i32) {
    %c0_i32 = arith.constant 0 : i32
    %c0_i32_0 = arith.constant 0 : i32
    %c0_i32_1 = arith.constant 0 : i32
    return %c0_i32, %c0_i32_0 : i32, i32
  }
  func.func @transform_8(%arg0: i32) -> (i32, i32) {
    %c0_i32 = arith.constant 0 : i32
    %c0_i32_0 = arith.constant 0 : i32
    %c0_i32_1 = arith.constant 0 : i32
    return %c0_i32, %c0_i32_0 : i32, i32
  }
  func.func @transform_9(%arg0: i32) -> (i32, i32, i32) {
    %c0_i32 = arith.constant 0 : i32
    %c0_i32_0 = arith.constant 0 : i32
    %c0_i32_1 = arith.constant 0 : i32
    return %arg0, %c0_i32, %c0_i32_0 : i32, i32, i32
  }
}

</mosaic_0001>

<bundles_post_ra>
// kernel: tpu_custom_call.1
= control target key start
LH: loop header
LB: loop body
LE: loop exit
PB: predicated region body
PF: predicated region fallthrough
CT: control target
= control target key end

     0   :  { %14 = vsyncpa [#allocation4], 0  ;;  %s3034_s0 = inlined_call_operand.vmem [shape: s8[3,128,128], index: 0, kind: input, shape index: {}]   ;;  %s3035_s1 = inlined_call_operand.vmem [shape: f32[3,128,1], index: 1, kind: input, shape index: {}]   ;;  %s3036_s2 = inlined_call_operand.vmem [shape: bf16[3,128,128], index: 2, kind: input, shape index: {}]   ;;  %s3037_s3 = inlined_call_operand.vmem [shape: bf16[128,128], index: 3, kind: input, shape index: {}]   ;;  %s3038_s4 = inlined_call_operand.hbm [shape: bf16[128,128], index: 4, kind: input, shape index: {}]   ;;  %s3039_s5 = inlined_call_operand.vmem [shape: f32[1,128], index: 5, kind: input, shape index: {}]   ;;  %s3040_s6 = inlined_call_operand.hbm [shape: bf16[128,128], index: 6, kind: input, shape index: {}]   ;;  %s3041_s7 = inlined_call_operand.hbm [shape: bf16[128,128], index: 7, kind: input, shape index: {}]   ;;  %s3042_s8 = inlined_call_operand.vmem [shape: f32[1,128], index: 8, kind: input, shape index: {}]   ;;  %s3043_s9 = inlined_call_operand.hbm [shape: f32[3,128,128], index: 9, kind: output, shape index: {}]  }
   0x1   :  { %15 = vsyncpa [#allocation7], 0 }
   0x2   :  { %16 = vsyncpa [#allocation5], 0 }
   0x3   :  { %18 = vsyncpa [#allocation5 + $0x1], 0  ;;  %s2602_s30 = smov 0   ;;  %s2604_s10 = smov 0  }
   0x4   :  { %s2606_s11 = smov 0   ;;  %s2608_s12 = smov 0  }
   0x5 LB: > { %s2623_s13 = sadd.s32 4294967295, %s2541_s12   ;;  %s1827_s14 = sadd.s32 4294967294, %s2541_s12   ;;  %s2541_s12 = sphi %s2608_s12, %s3059_s12   ;;  %s2537_s11 = sphi %s2606_s11, %s3058_s11   ;;  %s2533_s10 = sphi %s2604_s10, %s3057_s10   ;;  %s2529_s30 = sphi %s2602_s30, %s3056_s30  }
   0x6   : > { %s2627_s15 = sadd.s32 1, %s2541_s12   ;;  %s235_s16 = sadd.s32 1, %s2537_s11 }
   0x7   : > { %s232_s17 = ssub.s32 %s2541_s12, %s2627_s15  ;;  %p245_p0 = scmp.ne.s32.totalorder %s2537_s11, %s2533_s10 }
   0x8   : > { %p233_p1 = scmp.eq.s32.totalorder %s232_s17, 0  ;;  %p246_p2 = scmp.eq.s32.totalorder %s2623_s13, 2 }
   0x9   : > { %p251_p3 = scmp.ne.s32.totalorder %s2533_s10, %s2529_s30  ;;  %p252_p4 = scmp.eq.s32.totalorder %s1827_s14, 2 }
   0xa   : > { %s2638_s18 = scalar_select %p233_p1, %s2537_s11, %s235_s16  }
   0xb   : > { %p2640_p5 = por %p246_p2, %p245_p0  ;;  %p2644_p6 = por %p252_p4, %p251_p3 }
   0xc   : > { %p1828_p7 = scmp.ge.s32.totalorder %s2541_s12, 1  ;;  %p259_p8 = scmp.lt.s32.totalorder %s2541_s12, 4 }
   0xd   : > { %s3046_s19 = scalar_select %p2640_p5, 1, 0 }
   0xe   : > { %s3047_s20 = scalar_select %p2644_p6, 1, 0 }
   0xf   : > { %p3044_p9 = scmp.eq.s32.totalorder %s2623_s13, 0  ;;  %p2651_p10 = pnand %p1828_p7, %p259_p8 }
  0x10   : > { %s2543_s22 = smov [#allocation6]   ;;  %s2544_s25 = smov [#allocation3]  }
  0x11   : > { %p2284_p11 = pneg %p2651_p10  ;;  %s290_s23 = sshll.u32 %s2543_s22, 4  ;;  %s291_s23 = int_to_ptr.vmem [resolvable:$true] %s290_s23 }
  0x12   : > { %s274_s26 = sshll.u32 %s2544_s25, 4  ;;  %s2545_s27 = smov [#allocation8]   ;;  %s275_s26 = int_to_ptr.vmem [resolvable:$true] %s274_s26 }
  0x13   : > { %p2659_p12 = pnand %p3044_p9, %p2284_p11  ;;  %s303_s28 = sshll.u32 %s2545_s27, 4  ;;  %s304_s28 = int_to_ptr.vmem [resolvable:$true] %s303_s28 }
  0x14   : > { %s2406_s29 = scalar_lea.vmem %s291_s23, 1024  ;;  %p2414_p3 = scmp.lt.s32.totalorder %s291_s23, %s291_s23 }
  0x15   : > { %p2397_p13 = pneg %p2659_p12  ;;  %p2407_p0 = scmp.ne.s32.totalorder %s291_s23, %s2406_s29 }
  0x16   : > { %p2415_p4 = scmp.lt.s32.totalorder %s2406_s29, %s2406_s29 }
  0x17   : > { %p2409_p1 = pnand %p2407_p0, %p2397_p13 }
  0x18   : > { %p2416_p7 = por %p2415_p4, %p2414_p3 }
  0x19   : > { %p2410_p2 = pneg %p2409_p1 }
  0x1b   : > { %p2417_p8 = pnand %p2416_p7, %p2410_p2 }
  0x1d   : > { %2420 = shalt.err (!%p2417_p8)
}
  0x1e   : > { %s2546_s14 = smov 64   ;;  %s2547_s16 = smov 4  }
  0x1f   : > { %2290 = dma.hbm_to_vmem [thread:$0]  (!%p2659_p12), %s3040_s6, 1024, %s291_s23, [#allocation7], %s2546_s14, %s2546_s14, %s2547_s16  }
  0x20   : > { %s2432_s25 = scalar_lea.vmem %s275_s26, 1024  ;;  %p2440_p9 = scmp.lt.s32.totalorder %s275_s26, %s275_s26 }
  0x21   : > { %p2433_p11 = scmp.ne.s32.totalorder %s275_s26, %s2432_s25  ;;  %p2441_p6 = scmp.lt.s32.totalorder %s2432_s25, %s2432_s25 }
  0x23   : > { %p2435_p0 = pnand %p2433_p11, %p2397_p13  ;;  %p2442_p3 = por %p2441_p6, %p2440_p9 }
  0x25   : > { %p2436_p1 = pneg %p2435_p0 }
  0x27   : > { %p2443_p2 = pnand %p2442_p3, %p2436_p1 }
  0x29   : > { %2446 = shalt.err (!%p2443_p2)
}
  0x2a   : > { %2287 = dma.hbm_to_vmem [thread:$0]  (!%p2659_p12), %s3038_s4, 1024, %s275_s26, [#allocation4], %s2546_s14, %s2546_s14, %s2547_s16  }
  0x2b   : > { %s2458_s23 = scalar_lea.vmem %s304_s28, 1024  ;;  %p2466_p11 = scmp.lt.s32.totalorder %s304_s28, %s304_s28 }
  0x2c   : > { %p2459_p4 = scmp.ne.s32.totalorder %s304_s28, %s2458_s23  ;;  %p2467_p0 = scmp.lt.s32.totalorder %s2458_s23, %s2458_s23 }
  0x2e   : > { %p2461_p7 = pnand %p2459_p4, %p2397_p13  ;;  %p2468_p5 = por %p2467_p0, %p2466_p11 }
  0x30   : > { %p2462_p8 = pneg %p2461_p7 }
  0x32   : > { %p2469_p6 = pnand %p2468_p5, %p2462_p8 }
  0x34   : > { %2472 = shalt.err (!%p2469_p6)
}
  0x35   : > { %2293 = dma.hbm_to_vmem [thread:$0]  (!%p2659_p12), %s3041_s7, 1024, %s304_s28, [#allocation7], %s2546_s14, %s2546_s14, %s2547_s16  }
  0x36   : > { %346 = sbr.rel (%p2651_p10) target bundleno = 1020 (0x3fc), region = 56  ;;  %p3050_p9 = scmp.eq.s32.totalorder (!%p2651_p10), %s2623_s13, 0 }
  0x3b   : > { %2516 = dma.done.wait (%p3050_p9), [#allocation4], 1024   ;;  %p3051_p13 = pmov %p3050_p9 }
  0x3c   : > { %p3052_p1 = pmov %p3050_p9 }
  0x3d   : > { %2518 = vsyncadd (%p3051_p13), [#allocation4], 4294966272 }
  0x3e   : > { %2520 = dma.done.wait (%p3052_p1), [#allocation7], 2048   ;;  %p3053_p5 = pmov %p3052_p1 }
  0x3f   : > { %p400_p3 = scmp.lt.s32.totalorder %s2623_s13, 2  ;;  %v2548_v0 = vmov 0   ;;  %v2355_v16 = vld [vmem:[#allocation3 + $0x38] sm:$0xff]   ;;  %v2356_v17 = vld [vmem:[#allocation3 + $0x30] sm:$0xff]   ;;  %v2358_v21 = vld [vmem:[#allocation3 + $0x28] sm:$0xff]   ;;  %s397_s27 = sand.u32 1, %s2533_s10  }
  0x40   : > { %2522 = vsyncadd (%p3053_p5), [#allocation7], 4294965248  ;;  %2345 = vset.pattern.permute.xlu0 %v2548_v0  ;;  %2346 = vset.pattern.permute.xlu1 %v2548_v0  ;;  %v2360_v24 = vld [vmem:[#allocation3 + $0x20] sm:$0xff]   ;;  %v2357_v28 = vld [vmem:[%s3037_s3 + $0x38] sm:$0xff]   ;;  %s1837_s29 = sshll.u32 %s397_s27, 7  ;;  %p3054_p12 = scmp.ne.s32.totalorder %s3046_s19, 0 }
  0x41   : > { %s401_s21 = scalar_select %p400_p3, %s2623_s13, 2  ;;  %2110 = vmatprep.subr.bf16.mxu1 %v2355_v16  ;;  %v2362_v29 = vld [vmem:[#allocation3 + $0x18] sm:$0xff]   ;;  %v2359_v34 = vld [vmem:[%s3037_s3 + $0x30] sm:$0xff]   ;;  %v2361_v39 = vld [vmem:[%s3037_s3 + $0x28] sm:$0xff]  }
  0x42   : > { %2111 = vmatpush3.bf16.msra.mxu1 %v2355_v16  ;;  %v2364_v35 = vld [vmem:[#allocation3 + $0x10] sm:$0xff]   ;;  %v2366_v40 = vld [vmem:[#allocation3 + $0x8] sm:$0xff]   ;;  %v2363_v43 = vld [vmem:[%s3037_s3 + $0x20] sm:$0xff]  }
  0x43   : > { %s1917_s24 = sshll.u32 %s401_s21, 6  ;;  %s1915_s16 = sshll.u32 %s401_s21, 5  ;;  %2112 = vmatprep.subr.bf16.mxu1 %v2356_v17  ;;  %v2365_v45 = vld [vmem:[%s3037_s3 + $0x18] sm:$0xff]   ;;  %v2367_v49 = vld [vmem:[%s3037_s3 + $0x10] sm:$0xff]   ;;  %v2368_v50 = vld [vmem:[#allocation3] sm:$0xff]  }
  0x44   : > { %s2704_s14 = scalar_lea.vmem %s3036_s2, %s1917_s24  ;;  %s1916_s25 = sshll.u32 %s401_s21, 7  ;;  %v2369_v51 = vld [vmem:[%s3037_s3 + $0x8] sm:$0xff]   ;;  %v2370_v52 = vld [vmem:[%s3037_s3] sm:$0xff]   ;;  %v2371_v53 = vld [vmem:[#allocation8 + $0x38] sm:$0xff]  }
  0x45   : > { %v2707_v1 = vld [vmem:[%s2704_s14 + $0x38] sm:$0xff]   ;;  %v2710_v2 = vld [vmem:[%s2704_s14 + $0x30] sm:$0xff]   ;;  %v2716_v3 = vld [vmem:[%s2704_s14 + $0x28] sm:$0xff]   ;;  %s2721_s23 = scalar_lea.vmem %s3034_s0, %s1915_s16  ;;  %s2726_s24 = scalar_lea.vmem %s3035_s1, %s1916_s25 }
  0x46   : > { %2078 = vmatprep.subr.bf16.mxu0 %v2707_v1  ;;  %v2354_v4 = vld [vmem:[%s2704_s14] sm:$0xff]   ;;  %v430_v9 = vld [vmem:[%s2726_s24 + $0x10] sm:$0xff]  ;;  %v429_v10 = vld [vmem:[%s2726_s24 + $0x8] sm:$0xff]  ;;  %2113 = vmatpush3.bf16.msra.mxu1 %v2356_v17  ;;  %s2549_s25 = smov [#allocation9]  }
  0x47   : > { %2079 = vmatpush3.bf16.msra.mxu0 %v2707_v1  ;;  %v2732_v5 = vld [vmem:[%s2704_s14 + $0x20] sm:$0xff]   ;;  %2126 = vmatprep.mubr.bf16.mxu1 %v2354_v4  ;;  %v431_v11 = vld [vmem:[%s2726_s24 + $0x18] sm:$0xff]  ;;  %v2750_v13 = vld [vmem:[%s2704_s14 + $0x10] sm:$0xff]  }
  0x48   : > { %2080 = vmatprep.subr.bf16.mxu0 %v2710_v2  ;;  %v2735_v6 = vld [vmem:[%s2721_s23] sm:$0xff]  ;;  %617 = vperm.xlu1 %2346, %v430_v9   ;;  %v2747_v12 = vld [vmem:[%s2704_s14 + $0x18] sm:$0xff]   ;;  %v433_v15 = vld [vmem:[%s2726_s24 + $0x28] sm:$0xff] }
  0x49   : > { %v420_v7 = vunpack.c.l.s8.bf16 %v2735_v6  ;;  %v428_v8 = vld [vmem:[%s2726_s24] sm:$0xff]  ;;  %v2757_v18 = vld [vmem:[%s2704_s14 + $0x8] sm:$0xff]   ;;  %v434_v19 = vld [vmem:[%s2726_s24 + $0x30] sm:$0xff]  ;;  %2114 = vmatprep.subr.bf16.mxu1 %v2358_v21  ;;  %v421_v31 = vunpack.c.h.s8.bf16 %v2735_v6 }
  0x4a   : > { %607 = vperm.xlu0 %2345, %v428_v8   ;;  %v432_v14 = vld [vmem:[%s2726_s24 + $0x20] sm:$0xff]  ;;  %v435_v20 = vld [vmem:[%s2726_s24 + $0x38] sm:$0xff]  ;;  %v437_v23 = vld [vmem:[%s2726_s24 + $0x48] sm:$0xff]  ;;  %2115 = vmatpush3.bf16.msra.mxu1 %v2358_v21 }
  0x4b   : > { %2081 = vmatpush3.bf16.msra.mxu0 %v2710_v2  ;;  %2094 = vmatprep.mubr.bf16.mxu0 %v420_v7  ;;  %v436_v22 = vld [vmem:[%s2726_s24 + $0x40] sm:$0xff]  ;;  %v438_v25 = vld [vmem:[%s2726_s24 + $0x50] sm:$0xff]  ;;  %v439_v26 = vld [vmem:[%s2726_s24 + $0x58] sm:$0xff] }
  0x4c   : > { %2082 = vmatprep.subr.bf16.mxu0 %v2716_v3  ;;  %622 = vperm.xlu1 %2346, %v431_v11   ;;  %v2770_v27 = vld [vmem:[%s2721_s23 + $0x8] sm:$0xff]  ;;  %v440_v30 = vld [vmem:[%s2726_s24 + $0x60] sm:$0xff]  ;;  %v442_v36 = vld [vmem:[%s2726_s24 + $0x70] sm:$0xff] }
  0x4d   : > { %2116 = vmatprep.subr.bf16.mxu1 %v2360_v24  ;;  %v441_v32 = vld [vmem:[%s2726_s24 + $0x68] sm:$0xff]  ;;  %v422_v33 = vunpack.c.l.s8.bf16 %v2770_v27  ;;  %v2787_v37 = vld [vmem:[%s2721_s23 + $0x10] sm:$0xff]  ;;  %v443_v38 = vld [vmem:[%s2726_s24 + $0x78] sm:$0xff]  ;;  %v423_v41 = vunpack.c.h.s8.bf16 %v2770_v27  ;;  %s1934_s24 = sshll.u32 %s2623_s13, 11  ;;  %s2994_s13 = scalar_lea.sflag [#allocation5], %s397_s27 }
  0x4e   : > { %612 = vperm.xlu0 %2345, %v429_v10   ;;  %2117 = vmatpush3.bf16.msra.mxu1 %v2360_v24  ;;  %v424_v42 = vunpack.c.l.s8.bf16 %v2787_v37  ;;  %v2805_v44 = vld [vmem:[%s2721_s23 + $0x18] sm:$0xff]  ;;  %v425_v46 = vunpack.c.h.s8.bf16 %v2787_v37  ;;  %v2372_v11 = vld [vmem:[#allocation8 + $0x30] sm:$0xff]   ;;  %v2390_v27 = vld [vmem:[#allocation6 + $0x20] sm:$0xff]   ;;  %s2950_s23 = scalar_lea.vmem [#allocation9], %s1837_s29  ;;  %s2985_s14 = scalar_lea.hbm %s3043_s9, %s1934_s24 }
  0x4f   : > { %2083 = vmatpush3.bf16.msra.mxu0 %v2716_v3  ;;  %2118 = vmatprep.subr.bf16.mxu1 %v2362_v29  ;;  %v426_v47 = vunpack.c.l.s8.bf16 %v2805_v44  ;;  %v427_v48 = vunpack.c.h.s8.bf16 %v2805_v44  ;;  %v2387_v6 = vld [vmem:[#allocation6 + $0x38] sm:$0xff]   ;;  %v2392_v37 = vld [vmem:[#allocation6 + $0x10] sm:$0xff]   ;;  %v2394_v44 = vld [vmem:[#allocation6] sm:$0xff]   ;;  %s1710_s21 = sshll.u32 %s2950_s23, 4  ;;  %s2477_s29 = sshll.u32 %s2549_s25, 4  ;;  %s2987_s21 = int_to_ptr.vmem [resolvable:$true] %s1710_s21  ;;  %s2478_s29 = int_to_ptr.vmem [resolvable:$false] %s2477_s29 }
  0x50   : > { %2084 = vmatprep.subr.bf16.mxu0 %v2732_v5  ;;  %632 = vperm.xlu1 %2346, %v433_v15   ;;  %s2473_s16 = scalar_lea.vmem %s2987_s21, 2048  ;;  %s2479_s17 = scalar_lea.vmem %s2478_s29, 4096 }
  0x51   : > { %p2474_p10 = scmp.ne.s32.totalorder %s2987_s21, %s2473_s16  ;;  %p2480_p7 = scmp.lt.s32.totalorder %s2987_s21, %s2478_s29 }
  0x52   : > { %627 = vperm.xlu0 %2345, %v432_v14   ;;  %2119 = vmatpush3.bf16.msra.mxu1 %v2362_v29  ;;  %p2481_p8 = scmp.lt.s32.totalorder %s2479_s17, %s2473_s16 }
  0x53   : > { %2085 = vmatpush3.bf16.msra.mxu0 %v2732_v5  ;;  %2120 = vmatprep.subr.bf16.mxu1 %v2364_v35  ;;  %p2475_p2 = pnand %p2474_p10, %p3054_p12 }
  0x54   : > { %2086 = vmatprep.subr.bf16.mxu0 %v2747_v12  ;;  %642 = vperm.xlu1 %2346, %v435_v20   ;;  %p2482_p11 = por %p2481_p8, %p2480_p7 }
  0x55   : > { %p2476_p4 = pneg %p2475_p2 }
  0x56   : > { %637 = vperm.xlu0 %2345, %v434_v19   ;;  %2121 = vmatpush3.bf16.msra.mxu1 %v2364_v35 }
  0x57   : > { %2087 = vmatpush3.bf16.msra.mxu0 %v2747_v12  ;;  %2122 = vmatprep.subr.bf16.mxu1 %v2366_v40  ;;  %p2483_p0 = pnand %p2482_p11, %p2476_p4 }
  0x58   : > { %2088 = vmatprep.subr.bf16.mxu0 %v2750_v13  ;;  %652 = vperm.xlu1 %2346, %v437_v23  }
  0x5a   : > { %647 = vperm.xlu0 %2345, %v436_v22   ;;  %2123 = vmatpush3.bf16.msra.mxu1 %v2366_v40 }
  0x5b   : > { %2089 = vmatpush3.bf16.msra.mxu0 %v2750_v13  ;;  %2124 = vmatprep.subr.bf16.mxu1 %v2368_v50 }
  0x5c   : > { %2090 = vmatprep.subr.bf16.mxu0 %v2757_v18  ;;  %662 = vperm.xlu1 %2346, %v439_v26  }
  0x5e   : > { %657 = vperm.xlu0 %2345, %v438_v25   ;;  %2125 = vmatpush3.bf16.msra.mxu1 %v2368_v50 }
  0x5f   : > { %2091 = vmatpush3.bf16.msra.mxu0 %v2757_v18 }
  0x60   : > { %2092 = vmatprep.subr.bf16.mxu0 %v2354_v4  ;;  %672 = vperm.xlu1 %2346, %v441_v32  }
  0x61   : > { %2127 = vmatmul.mubr.bf16.vlgmr.msra.gmra.mxu1 %v2757_v18 }
  0x62   : > { %667 = vperm.xlu0 %2345, %v440_v30   ;;  %2130 = vmatprep.mubr.bf16.mxu1 %v2750_v13 }
  0x63   : > { %2093 = vmatpush3.bf16.msra.mxu0 %v2354_v4 }
  0x64   : > { %2142 = vmatprep.subr.bf16.mxu0 %v2357_v28  ;;  %682 = vperm.xlu1 %2346, %v443_v38  }
  0x66   : > { %2095 = vmatmul.mubr.bf16.vlgmr.msra.gmra.mxu0 %v421_v31  ;;  %677 = vperm.xlu0 %2345, %v442_v36  }
  0x67   : > { %2098 = vmatprep.mubr.bf16.mxu0 %v422_v33  ;;  %2143 = vmatpush3.bf16.msra.mxu0 %v2357_v28 }
  0x68   : > { %2144 = vmatprep.subr.bf16.mxu0 %v2359_v34 }
  0x69   : > { %2131 = vmatmul.mubr.bf16.gmra.mxu1 %v2747_v12 }
  0x6a   : > { %2134 = vmatprep.mubr.bf16.mxu1 %v2732_v5 }
  0x6b   : > { %2145 = vmatpush3.bf16.msra.mxu0 %v2359_v34 }
  0x6c   : > { %2146 = vmatprep.subr.bf16.mxu0 %v2361_v39 }
  0x6e   : > { %2099 = vmatmul.mubr.bf16.gmra.mxu0 %v423_v41 }
  0x6f   : > { %2102 = vmatprep.mubr.bf16.mxu0 %v424_v42  ;;  %2147 = vmatpush3.bf16.msra.mxu0 %v2361_v39 }
  0x70   : > { %2148 = vmatprep.subr.bf16.mxu0 %v2363_v43 }
  0x71   : > { %2135 = vmatmul.mubr.bf16.gmra.mxu1 %v2716_v3 }
  0x72   : > { %2138 = vmatprep.mubr.bf16.mxu1 %v2710_v2 }
  0x73   : > { %2149 = vmatpush3.bf16.msra.mxu0 %v2363_v43 }
  0x74   : > { %2150 = vmatprep.subr.bf16.mxu0 %v2365_v45 }
  0x76   : > { %2103 = vmatmul.mubr.bf16.gmra.mxu0 %v425_v46 }
  0x77   : > { %2106 = vmatprep.mubr.bf16.mxu0 %v426_v47  ;;  %2151 = vmatpush3.bf16.msra.mxu0 %v2365_v45 }
  0x78   : > { %2152 = vmatprep.subr.bf16.mxu0 %v2367_v49 }
  0x79   : > { %2139 = vmatmul.mubr.bf16.gmra.mxu1 %v2707_v1 }
  0x7a   : > { %2190 = vmatprep.mubr.bf16.mxu1 %v420_v7 }
  0x7b   : > { %2153 = vmatpush3.bf16.msra.mxu0 %v2367_v49 }
  0x7c   : > { %2154 = vmatprep.subr.bf16.mxu0 %v2369_v51 }
  0x7e   : > { %2107 = vmatmul.mubr.bf16.gmra.mxu0 %v427_v48 }
  0x7f   : > { %2155 = vmatpush3.bf16.msra.mxu0 %v2369_v51 }
  0x80   : > { %2156 = vmatprep.subr.bf16.mxu0 %v2370_v52 }
  0x83   : > { %2157 = vmatpush3.bf16.msra.mxu0 %v2370_v52 }
  0x84   : > { %2206 = vmatprep.subr.bf16.mxu0 %v2371_v53 }
  0xc3   : > { %v2837_v54 = vpop.permute.xlu1 %617 }
  0xc5   : > { %v2839_v55 = vpop.permute.xlu0 %607 }
  0xc7   : > { %v2841_v56 = vpop.permute.xlu1 %622 }
  0xc9   : > { %v2843_v57 = vpop.permute.xlu0 %612 }
  0xcb   : > { %v2845_v58 = vpop.permute.xlu1 %632 }
  0xcd   : > { %v2847_v60 = vpop.permute.xlu0 %627 }
  0xcf   : > { %v2849_v63 = vpop.permute.xlu1 %642 }
  0xd1   : > { %v2852_v2 = vpop.permute.xlu0 %637 }
  0xd3   : > { %v2857_v12 = vpop.permute.xlu1 %652 }
  0xd5   : > { %v2859_v14 = vpop.permute.xlu0 %647 }
  0xd7   : > { %v2865_v21 = vpop.permute.xlu1 %662 }
  0xd9   : > { %v2867_v25 = vpop.permute.xlu0 %657 }
  0xdb   : > { %v2870_v30 = vpop.permute.xlu1 %672 }
  0xdd   : > { %v2875_v38 = vpop.permute.xlu0 %667 }
  0xdf   : > { %v2877_v49 = vpop.permute.xlu1 %682 }
  0xe1   : > { %v2880_v52 = vpop.permute.xlu0 %677 }
 0x126   : > { %v2096_v59 = vpop.f32.mrf.mxu0 }
 0x127   : > { %v687_v5 = vmul.f32 %v2096_v59, %v2837_v54 }
 0x128   : > { %v542_v61 = vpop.f32.mrf.mxu0 }
 0x129   : > { %v685_v3 = vmul.f32 %v2839_v55, %v542_v61 }
 0x12a   : > { %v2097_v62 = vpop.f32.mrf.mxu0 }
 0x12b   : > { %v688_v0 = vmul.f32 %v2097_v62, %v2841_v56 }
 0x12c   : > { %v545_v1 = vpop.f32.mrf.mxu0 }
 0x12d   : > { %v686_v4 = vmul.f32 %v2843_v57, %v545_v1  ;;  %v702_v9 = vpack.c.bf16 %v688_v0, %v687_v5  ;;  %v2373_v1 = vld [vmem:[#allocation8 + $0x28] sm:$0xff]   ;;  %v2376_v5 = vld [vmem:[#allocation8 + $0x10] sm:$0xff]  }
 0x12e   : > { %v2100_v7 = vpop.f32.mrf.mxu0 }
 0x12f   : > { %v701_v8 = vpack.c.bf16 %v686_v4, %v685_v3  ;;  %v691_v19 = vmul.f32 %v2100_v7, %v2852_v2  ;;  %v2374_v3 = vld [vmem:[#allocation8 + $0x20] sm:$0xff]   ;;  %v2375_v4 = vld [vmem:[#allocation8 + $0x18] sm:$0xff]   ;;  %v2377_v7 = vld [vmem:[#allocation8 + $0x8] sm:$0xff]  }
 0x130   : > { %v558_v10 = vpop.f32.mrf.mxu0 }
 0x131   : > { %2158 = vmatprep.mubr.bf16.mxu0 %v701_v8  ;;  %v689_v17 = vmul.f32 %v2847_v60, %v558_v10  ;;  %v2378_v8 = vld [vmem:[#allocation8] sm:$0xff]  }
 0x132   : > { %v2101_v13 = vpop.f32.mrf.mxu0  ;;  %2159 = vmatmul.mubr.bf16.vlgmr.msra.gmra.mxu0 %v702_v9  ;;  %v2128_v9 = vpop.f32.mrf.mxu1 }
 0x133   : > { %2207 = vmatpush3.bf16.msra.mxu0 %v2371_v53  ;;  %v692_v15 = vmul.f32 %v2101_v13, %v2849_v63 }
 0x134   : > { %v561_v16 = vpop.f32.mrf.mxu0  ;;  %2208 = vmatprep.subr.bf16.mxu0 %v2372_v11  ;;  %v823_v10 = vpop.f32.mrf.mxu1 }
 0x135   : > { %v690_v18 = vmul.f32 %v2845_v58, %v561_v16  ;;  %v704_v23 = vpack.c.bf16 %v692_v15, %v691_v19 }
 0x136   : > { %v2104_v20 = vpop.f32.mrf.mxu0 }
 0x137   : > { %v703_v22 = vpack.c.bf16 %v690_v18, %v689_v17  ;;  %2209 = vmatpush3.bf16.msra.mxu0 %v2372_v11  ;;  %v695_v35 = vmul.f32 %v2104_v20, %v2867_v25  ;;  %v2129_v11 = vpop.f32.mrf.mxu1 }
 0x138   : > { %v574_v24 = vpop.f32.mrf.mxu0  ;;  %2210 = vmatprep.subr.bf16.mxu0 %v2373_v1 }
 0x139   : > { %2162 = vmatprep.mubr.bf16.mxu0 %v703_v22  ;;  %v693_v32 = vmul.f32 %v2859_v14, %v574_v24  ;;  %v826_v13 = vpop.f32.mrf.mxu1  ;;  %v2888_v22 = vld [vmem:[%s3039_s5] ss:$0 sm:$0xff] }
 0x13a   : > { %v2105_v26 = vpop.f32.mrf.mxu0  ;;  %2163 = vmatmul.mubr.bf16.gmra.mxu0 %v704_v23 }
 0x13b   : > { %v696_v28 = vmul.f32 %v2105_v26, %v2865_v21  ;;  %2211 = vmatpush3.bf16.msra.mxu0 %v2373_v1  ;;  %v2132_v15 = vpop.f32.mrf.mxu1 }
 0x13c   : > { %v577_v29 = vpop.f32.mrf.mxu0  ;;  %2212 = vmatprep.subr.bf16.mxu0 %v2374_v3 }
 0x13d   : > { %v694_v34 = vmul.f32 %v2857_v12, %v577_v29  ;;  %v706_v40 = vpack.c.bf16 %v696_v28, %v695_v35  ;;  %v839_v16 = vpop.f32.mrf.mxu1 }
 0x13e   : > { %v2108_v36 = vpop.f32.mrf.mxu0 }
 0x13f   : > { %v705_v39 = vpack.c.bf16 %v694_v34, %v693_v32  ;;  %v699_v61 = vmul.f32 %v2108_v36, %v2880_v52  ;;  %2213 = vmatpush3.bf16.msra.mxu0 %v2374_v3  ;;  %v2133_v17 = vpop.f32.mrf.mxu1 }
 0x140   : > { %v590_v43 = vpop.f32.mrf.mxu0  ;;  %2214 = vmatprep.subr.bf16.mxu0 %v2375_v4 }
 0x141   : > { %2166 = vmatprep.mubr.bf16.mxu0 %v705_v39  ;;  %v697_v53 = vmul.f32 %v2875_v38, %v590_v43  ;;  %v842_v18 = vpop.f32.mrf.mxu1 }
 0x142   : > { %v2109_v45 = vpop.f32.mrf.mxu0  ;;  %2167 = vmatmul.mubr.bf16.gmra.mxu0 %v706_v40 }
 0x143   : > { %v700_v50 = vmul.f32 %v2109_v45, %v2877_v49  ;;  %2215 = vmatpush3.bf16.msra.mxu0 %v2375_v4  ;;  %v2136_v24 = vpop.f32.mrf.mxu1 }
 0x144   : > { %v593_v51 = vpop.f32.mrf.mxu0  ;;  %2216 = vmatprep.subr.bf16.mxu0 %v2376_v5 }
 0x145   : > { %v698_v59 = vmul.f32 %v2870_v30, %v593_v51  ;;  %v708_v0 = vpack.c.bf16 %v700_v50, %v699_v61  ;;  %v855_v35 = vpop.f32.mrf.mxu1 }
 0x147   : > { %v707_v62 = vpack.c.bf16 %v698_v59, %v697_v53  ;;  %2217 = vmatpush3.bf16.msra.mxu0 %v2376_v5  ;;  %v2137_v61 = vpop.f32.mrf.mxu1 }
 0x148   : > { %2218 = vmatprep.subr.bf16.mxu0 %v2377_v7 }
 0x149   : > { %2170 = vmatprep.mubr.bf16.mxu0 %v707_v62 }
 0x14a   : > { %2171 = vmatmul.mubr.bf16.gmra.mxu0 %v708_v0 }
 0x14b   : > { %2219 = vmatpush3.bf16.msra.mxu0 %v2377_v7 }
 0x14c   : > { %2220 = vmatprep.subr.bf16.mxu0 %v2378_v8 }
 0x14f   : > { %2221 = vmatpush3.bf16.msra.mxu0 %v2378_v8 }
 0x1f2   : > { %v2160_v19 = vpop.f32.mrf.mxu0 }
 0x1f3   : > { %v977_v20 = vadd.f32 %v2160_v19, %v2128_v9 }
 0x1f4   : > { %v968_v23 = vpop.f32.mrf.mxu0 }
 0x1f5   : > { %v969_v26 = vadd.f32 %v968_v23, %v823_v10  ;;  %v1040_v29 = vadd.f32 %v2888_v22, %v977_v20  ;;  %v858_v10 = vpop.f32.mrf.mxu1 }
 0x1f6   : > { %v2161_v28 = vpop.f32.mrf.mxu0 }
 0x1f7   : > { %v980_v32 = vadd.f32 %v2161_v28, %v2129_v11  ;;  %v1038_v36 = vadd.f32 %v2888_v22, %v969_v26  ;;  %v1056_v45 = vmax.f32 %v1040_v29, 0.0  ;;  %v2140_v28 = vpop.f32.mrf.mxu1 }
 0x1f8   : > { %v971_v34 = vpop.f32.mrf.mxu0 }
 0x1f9   : > { %v1041_v39 = vadd.f32 %v2888_v22, %v980_v32  ;;  %v972_v40 = vadd.f32 %v971_v34, %v826_v13  ;;  %v1054_v62 = vmax.f32 %v1038_v36, 0.0 }
 0x1fa   : > { %v2164_v43 = vpop.f32.mrf.mxu0 }
 0x1fb   : > { %v1057_v50 = vmax.f32 %v1041_v39, 0.0  ;;  %v1039_v51 = vadd.f32 %v2888_v22, %v972_v40  ;;  %v993_v53 = vadd.f32 %v2164_v43, %v2132_v15 }
 0x1fc   : > { %v984_v59 = vpop.f32.mrf.mxu0 }
 0x1fd   : > { %v1943_v0 = vpack.c.bf16 %v1057_v50, %v1056_v45  ;;  %v1055_v1 = vmax.f32 %v1039_v51, 0.0  ;;  %v985_v3 = vadd.f32 %v984_v59, %v839_v16  ;;  %v1044_v7 = vadd.f32 %v2888_v22, %v993_v53  ;;  %v871_v50 = vpop.f32.mrf.mxu1 }
 0x1fe   : > { %v2165_v4 = vpop.f32.mrf.mxu0 }
 0x1ff   : > { %1975 = vst [vmem:[#allocation2 + $0x8] sm:$0xff] %v1943_v0   ;;  %v1938_v5 = vpack.c.bf16 %v1055_v1, %v1054_v62  ;;  %v996_v8 = vadd.f32 %v2165_v4, %v2133_v17  ;;  %v1042_v11 = vadd.f32 %v2888_v22, %v985_v3  ;;  %v1060_v20 = vmax.f32 %v1044_v7, 0.0 }
 0x200   : > { %v987_v9 = vpop.f32.mrf.mxu0 }
 0x201   : > { %1939 = vst [vmem:[#allocation2] sm:$0xff] %v1938_v5   ;;  %v1045_v13 = vadd.f32 %v2888_v22, %v996_v8  ;;  %v988_v15 = vadd.f32 %v987_v9, %v842_v18  ;;  %v1058_v32 = vmax.f32 %v1042_v11, 0.0 }
 0x202   : > { %v2168_v19 = vpop.f32.mrf.mxu0 }
 0x203   : > { %v1061_v23 = vmax.f32 %v1045_v13, 0.0  ;;  %v1043_v26 = vadd.f32 %v2888_v22, %v988_v15  ;;  %v1009_v16 = vadd.f32 %v2168_v19, %v2136_v24 }
 0x204   : > { %v1000_v29 = vpop.f32.mrf.mxu0 }
 0x205   : > { %v1953_v34 = vpack.c.bf16 %v1061_v23, %v1060_v20  ;;  %v1059_v36 = vmax.f32 %v1043_v26, 0.0  ;;  %v1001_v17 = vadd.f32 %v1000_v29, %v855_v35  ;;  %v1048_v43 = vadd.f32 %v2888_v22, %v1009_v16 }
 0x206   : > { %v2169_v39 = vpop.f32.mrf.mxu0  ;;  %v2380_v62 = vld [vmem:[#allocation2 + $0x8] sm:$0xff]  }
 0x207   : > { %1977 = vst [vmem:[#allocation2 + $0x18] sm:$0xff] %v1953_v34   ;;  %v1948_v40 = vpack.c.bf16 %v1059_v36, %v1058_v32  ;;  %v1012_v45 = vadd.f32 %v2169_v39, %v2137_v61  ;;  %v1046_v53 = vadd.f32 %v2888_v22, %v1001_v17  ;;  %v1064_v35 = vmax.f32 %v1048_v43, 0.0  ;;  %v2141_v61 = vpop.f32.mrf.mxu1 }
 0x208   : > { %v1003_v18 = vpop.f32.mrf.mxu0  ;;  %v2899_v51 = vld [vmem:[#allocation2] sm:$0xff]  }
 0x209   : > { %1976 = vst [vmem:[#allocation2 + $0x10] sm:$0xff] %v1948_v40   ;;  %v1049_v24 = vadd.f32 %v2888_v22, %v1012_v45  ;;  %v1004_v59 = vadd.f32 %v1003_v18, %v858_v10  ;;  %2222 = vmatprep.mubr.bf16.mxu0 %v2899_v51  ;;  %v1062_v7 = vmax.f32 %v1046_v53, 0.0  ;;  %v874_v20 = vpop.f32.mrf.mxu1 }
 0x20a   : > { %v2172_v0 = vpop.f32.mrf.mxu0  ;;  %2223 = vmatmul.mubr.bf16.vlgmr.msra.gmra.mxu0 %v2380_v62 }
 0x20b   : > { %v1065_v1 = vmax.f32 %v1049_v24, 0.0  ;;  %v1047_v3 = vadd.f32 %v2888_v22, %v1004_v59  ;;  %v1025_v4 = vadd.f32 %v2172_v0, %v2140_v28 }
 0x20c   : > { %v1016_v5 = vpop.f32.mrf.mxu0 }
 0x20d   : > { %v1963_v8 = vpack.c.bf16 %v1065_v1, %v1064_v35  ;;  %v1063_v9 = vmax.f32 %v1047_v3, 0.0  ;;  %v1017_v11 = vadd.f32 %v1016_v5, %v871_v50  ;;  %v1052_v10 = vadd.f32 %v2888_v22, %v1025_v4 }
 0x20e   : > { %v2173_v13 = vpop.f32.mrf.mxu0  ;;  %v2382_v32 = vld [vmem:[#allocation2 + $0x18] sm:$0xff]  }
 0x20f   : > { %1979 = vst [vmem:[#allocation2 + $0x28] sm:$0xff] %v1963_v8   ;;  %v1958_v15 = vpack.c.bf16 %v1063_v9, %v1062_v7  ;;  %v1028_v19 = vadd.f32 %v2173_v13, %v2141_v61  ;;  %v1050_v16 = vadd.f32 %v2888_v22, %v1017_v11  ;;  %v1068_v34 = vmax.f32 %v1052_v10, 0.0 }
 0x210   : > { %v1019_v23 = vpop.f32.mrf.mxu0  ;;  %v2381_v26 = vld [vmem:[#allocation2 + $0x10] sm:$0xff]  }
 0x211   : > { %1978 = vst [vmem:[#allocation2 + $0x20] sm:$0xff] %v1958_v15   ;;  %v1053_v28 = vadd.f32 %v2888_v22, %v1028_v19  ;;  %v1020_v29 = vadd.f32 %v1019_v23, %v874_v20  ;;  %2226 = vmatprep.mubr.bf16.mxu0 %v2381_v26  ;;  %v1066_v39 = vmax.f32 %v1050_v16, 0.0 }
 0x212   : > { %2227 = vmatmul.mubr.bf16.gmra.mxu0 %v2382_v32 }
 0x213   : > { %v1069_v36 = vmax.f32 %v1053_v28, 0.0  ;;  %v1051_v17 = vadd.f32 %v2888_v22, %v1020_v29 }
 0x215   : > { %v1973_v40 = vpack.c.bf16 %v1069_v36, %v1068_v34  ;;  %v1067_v43 = vmax.f32 %v1051_v17, 0.0 }
 0x216   : > { %v2384_v18 = vld [vmem:[#allocation2 + $0x28] sm:$0xff]  }
 0x217   : > { %1981 = vst [vmem:[#allocation2 + $0x38] sm:$0xff] %v1973_v40   ;;  %v1968_v45 = vpack.c.bf16 %v1067_v43, %v1066_v39 }
 0x218   : > { %v2383_v50 = vld [vmem:[#allocation2 + $0x20] sm:$0xff]  }
 0x219   : > { %1980 = vst [vmem:[#allocation2 + $0x30] sm:$0xff] %v1968_v45   ;;  %2230 = vmatprep.mubr.bf16.mxu0 %v2383_v50 }
 0x21a   : > { %2231 = vmatmul.mubr.bf16.gmra.mxu0 %v2384_v18 }
 0x21e   : > { %v2385_v53 = vld [vmem:[#allocation2 + $0x38] sm:$0xff]  }
 0x21f   : > { %2174 = vmatprep.subr.bf16.mxu1 %v2385_v53 }
 0x220   : > { %v2386_v24 = vld [vmem:[#allocation2 + $0x30] sm:$0xff]   ;;  %2175 = vmatpush3.bf16.msra.mxu1 %v2385_v53 }
 0x221   : > { %2176 = vmatprep.subr.bf16.mxu1 %v2386_v24  ;;  %2234 = vmatprep.mubr.bf16.mxu0 %v2386_v24 }
 0x222   : > { %2235 = vmatmul.mubr.bf16.gmra.mxu0 %v2385_v53 }
 0x224   : > { %2177 = vmatpush3.bf16.msra.mxu1 %v2386_v24 }
 0x225   : > { %2178 = vmatprep.subr.bf16.mxu1 %v2384_v18 }
 0x228   : > { %2179 = vmatpush3.bf16.msra.mxu1 %v2384_v18 }
 0x229   : > { %2180 = vmatprep.subr.bf16.mxu1 %v2383_v50 }
 0x22c   : > { %2181 = vmatpush3.bf16.msra.mxu1 %v2383_v50 }
 0x22d   : > { %2182 = vmatprep.subr.bf16.mxu1 %v2382_v32 }
 0x230   : > { %2183 = vmatpush3.bf16.msra.mxu1 %v2382_v32 }
 0x231   : > { %2184 = vmatprep.subr.bf16.mxu1 %v2381_v26 }
 0x234   : > { %2185 = vmatpush3.bf16.msra.mxu1 %v2381_v26 }
 0x235   : > { %2186 = vmatprep.subr.bf16.mxu1 %v2380_v62 }
 0x238   : > { %2187 = vmatpush3.bf16.msra.mxu1 %v2380_v62 }
 0x239   : > { %2188 = vmatprep.subr.bf16.mxu1 %v2899_v51 }
 0x23c   : > { %2189 = vmatpush3.bf16.msra.mxu1 %v2899_v51 }
 0x23d   : > { %2238 = vmatprep.subr.bf16.mxu1 %v2387_v6 }
 0x23f   : > { %2191 = vmatmul.mubr.bf16.vlgmr.msra.gmra.mxu1 %v421_v31  ;;  %v2388_v31 = vld [vmem:[#allocation6 + $0x30] sm:$0xff]  }
 0x240   : > { %2194 = vmatprep.mubr.bf16.mxu1 %v422_v33  ;;  %2239 = vmatpush3.bf16.msra.mxu1 %v2387_v6  ;;  %v2389_v33 = vld [vmem:[#allocation6 + $0x28] sm:$0xff]  }
 0x241   : > { %2240 = vmatprep.subr.bf16.mxu1 %v2388_v31 }
 0x244   : > { %2241 = vmatpush3.bf16.msra.mxu1 %v2388_v31 }
 0x245   : > { %2242 = vmatprep.subr.bf16.mxu1 %v2389_v33 }
 0x247   : > { %2195 = vmatmul.mubr.bf16.gmra.mxu1 %v423_v41  ;;  %v2391_v41 = vld [vmem:[#allocation6 + $0x18] sm:$0xff]  }
 0x248   : > { %2198 = vmatprep.mubr.bf16.mxu1 %v424_v42  ;;  %2243 = vmatpush3.bf16.msra.mxu1 %v2389_v33  ;;  %v2393_v42 = vld [vmem:[#allocation6 + $0x8] sm:$0xff]  }
 0x249   : > { %2244 = vmatprep.subr.bf16.mxu1 %v2390_v27 }
 0x24c   : > { %2245 = vmatpush3.bf16.msra.mxu1 %v2390_v27 }
 0x24d   : > { %2246 = vmatprep.subr.bf16.mxu1 %v2391_v41 }
 0x24f   : > { %2199 = vmatmul.mubr.bf16.gmra.mxu1 %v425_v46 }
 0x250   : > { %2202 = vmatprep.mubr.bf16.mxu1 %v426_v47  ;;  %2247 = vmatpush3.bf16.msra.mxu1 %v2391_v41 }
 0x251   : > { %2248 = vmatprep.subr.bf16.mxu1 %v2392_v37 }
 0x254   : > { %2249 = vmatpush3.bf16.msra.mxu1 %v2392_v37 }
 0x255   : > { %2250 = vmatprep.subr.bf16.mxu1 %v2393_v42 }
 0x257   : > { %2203 = vmatmul.mubr.bf16.gmra.mxu1 %v427_v48 }
 0x258   : > { %2251 = vmatpush3.bf16.msra.mxu1 %v2393_v42 }
 0x259   : > { %2252 = vmatprep.subr.bf16.mxu1 %v2394_v44 }
 0x25c   : > { %2253 = vmatpush3.bf16.msra.mxu1 %v2394_v44 }
 0x2ca   : > { %v2224_v32 = vpop.f32.mrf.mxu0 }
 0x2cc   : > { %v1449_v34 = vpop.f32.mrf.mxu0 }
 0x2ce   : > { %v2225_v36 = vpop.f32.mrf.mxu0 }
 0x2d0   : > { %v1452_v17 = vpop.f32.mrf.mxu0 }
 0x2d2   : > { %v2228_v39 = vpop.f32.mrf.mxu0 }
 0x2d4   : > { %v1465_v40 = vpop.f32.mrf.mxu0 }
 0x2ff   : > { %v2192_v46 = vpop.f32.mrf.mxu1 }
 0x300   : > { %v1313_v0 = vmul.f32 %v2192_v46, %v2837_v54 }
 0x301   : > { %v1248_v47 = vpop.f32.mrf.mxu1 }
 0x302   : > { %v1311_v59 = vmul.f32 %v1248_v47, %v2839_v55 }
 0x303   : > { %v2193_v48 = vpop.f32.mrf.mxu1 }
 0x304   : > { %v1314_v22 = vmul.f32 %v2193_v48, %v2841_v56 }
 0x305   : > { %v1251_v51 = vpop.f32.mrf.mxu1 }
 0x306   : > { %v1312_v62 = vmul.f32 %v1251_v51, %v2843_v57  ;;  %v1328_v3 = vpack.c.bf16 %v1314_v22, %v1313_v0 }
 0x307   : > { %v2196_v35 = vpop.f32.mrf.mxu1 }
 0x308   : > { %v1327_v1 = vpack.c.bf16 %v1312_v62, %v1311_v59  ;;  %v1317_v55 = vmul.f32 %v2196_v35, %v2852_v2 }
 0x309   : > { %v1264_v4 = vpop.f32.mrf.mxu1 }
 0x30a   : > { %2254 = vmatprep.mubr.bf16.mxu1 %v1327_v1  ;;  %v1315_v8 = vmul.f32 %v1264_v4, %v2847_v60 }
 0x30b   : > { %v2197_v61 = vpop.f32.mrf.mxu1  ;;  %2255 = vmatmul.mubr.bf16.vlgmr.msra.gmra.mxu1 %v1328_v3 }
 0x30c   : > { %v1318_v5 = vmul.f32 %v2197_v61, %v2849_v63 }
 0x30d   : > { %v1267_v7 = vpop.f32.mrf.mxu1 }
 0x30e   : > { %v1316_v56 = vmul.f32 %v1267_v7, %v2845_v58  ;;  %v1330_v11 = vpack.c.bf16 %v1318_v5, %v1317_v55 }
 0x30f   : > { %v2200_v9 = vpop.f32.mrf.mxu1 }
 0x310   : > { %v1329_v57 = vpack.c.bf16 %v1316_v56, %v1315_v8  ;;  %v1321_v60 = vmul.f32 %v2200_v9, %v2867_v25 }
 0x311   : > { %v1280_v54 = vpop.f32.mrf.mxu1 }
 0x312   : > { %2258 = vmatprep.mubr.bf16.mxu1 %v1329_v57  ;;  %v1319_v19 = vmul.f32 %v1280_v54, %v2859_v14 }
 0x313   : > { %v2201_v13 = vpop.f32.mrf.mxu1  ;;  %2259 = vmatmul.mubr.bf16.gmra.mxu1 %v1330_v11 }
 0x314   : > { %v1322_v15 = vmul.f32 %v2201_v13, %v2865_v21 }
 0x315   : > { %v1283_v10 = vpop.f32.mrf.mxu1 }
 0x316   : > { %v1320_v63 = vmul.f32 %v1283_v10, %v2857_v12  ;;  %v1332_v23 = vpack.c.bf16 %v1322_v15, %v1321_v60 }
 0x317   : > { %v2204_v20 = vpop.f32.mrf.mxu1 }
 0x318   : > { %v1331_v58 = vpack.c.bf16 %v1320_v63, %v1319_v19  ;;  %v1325_v12 = vmul.f32 %v2204_v20, %v2880_v52 }
 0x319   : > { %v1296_v2 = vpop.f32.mrf.mxu1 }
 0x31a   : > { %2262 = vmatprep.mubr.bf16.mxu1 %v1331_v58  ;;  %v1323_v21 = vmul.f32 %v1296_v2, %v2875_v38 }
 0x31b   : > { %v2205_v26 = vpop.f32.mrf.mxu1  ;;  %2263 = vmatmul.mubr.bf16.gmra.mxu1 %v1332_v23 }
 0x31c   : > { %v1326_v16 = vmul.f32 %v2205_v26, %v2877_v49  ;;  %v2229_v49 = vpop.f32.mrf.mxu0 }
 0x31d   : > { %v1299_v28 = vpop.f32.mrf.mxu1 }
 0x31e   : > { %v1324_v14 = vmul.f32 %v1299_v28, %v2870_v30  ;;  %v1334_v25 = vpack.c.bf16 %v1326_v16, %v1325_v12  ;;  %v1468_v43 = vpop.f32.mrf.mxu0  ;;  %v2947_v30 = vld [vmem:[%s3042_s8] ss:$0 sm:$0xff] }
 0x320   : > { %v1333_v29 = vpack.c.bf16 %v1324_v14, %v1323_v21  ;;  %v2232_v45 = vpop.f32.mrf.mxu0 }
 0x322   : > { %2266 = vmatprep.mubr.bf16.mxu1 %v1333_v29  ;;  %v1481_v33 = vpop.f32.mrf.mxu0 }
 0x323   : > { %2267 = vmatmul.mubr.bf16.gmra.mxu1 %v1334_v25 }
 0x324   : > { %v2233_v47 = vpop.f32.mrf.mxu0 }
 0x326   : > { %v1484_v35 = vpop.f32.mrf.mxu0 }
 0x328   : > { %v2236_v8 = vpop.f32.mrf.mxu0 }
 0x32a   : > { %v1497_v13 = vpop.f32.mrf.mxu0 }
 0x32c   : > { %v2237_v58 = vpop.f32.mrf.mxu0 }
 0x32e   : > { %v1500_v14 = vpop.f32.mrf.mxu0 }
 0x3cb   : > { %v2256_v38 = vpop.f32.mrf.mxu1 }
 0x3cc   : > { %v1603_v52 = vadd.f32 %v2256_v38, %v2224_v32 }
 0x3cd   : > { %v1594_v50 = vpop.f32.mrf.mxu1 }
 0x3ce   : > { %v1666_v18 = vadd.f32 %v2947_v30, %v1603_v52  ;;  %v1595_v53 = vadd.f32 %v1594_v50, %v1449_v34 }
 0x3cf   : > { %v2257_v24 = vpop.f32.mrf.mxu1 }
 0x3d0   : > { %1682 = vst [vmem:[%s2950_s23 + $0x10] sm:$0xff] %v1666_v18  ;;  %v1664_v6 = vadd.f32 %v2947_v30, %v1595_v53  ;;  %v1606_v31 = vadd.f32 %v2257_v24, %v2225_v36 }
 0x3d1   : > { %v1597_v27 = vpop.f32.mrf.mxu1 }
 0x3d2   : > { %1680 = vst [vmem:[%s2950_s23] sm:$0xff] %v1664_v6  ;;  %v1667_v41 = vadd.f32 %v2947_v30, %v1606_v31  ;;  %v1598_v37 = vadd.f32 %v1597_v27, %v1452_v17 }
 0x3d3   : > { %v2260_v42 = vpop.f32.mrf.mxu1 }
 0x3d4   : > { %1683 = vst [vmem:[%s2950_s23 + $0x18] sm:$0xff] %v1667_v41  ;;  %v1665_v44 = vadd.f32 %v2947_v30, %v1598_v37  ;;  %v1619_v46 = vadd.f32 %v2260_v42, %v2228_v39 }
 0x3d5   : > { %v1610_v48 = vpop.f32.mrf.mxu1 }
 0x3d6   : > { %1681 = vst [vmem:[%s2950_s23 + $0x8] sm:$0xff] %v1665_v44  ;;  %v1670_v22 = vadd.f32 %v2947_v30, %v1619_v46  ;;  %v1611_v51 = vadd.f32 %v1610_v48, %v1465_v40 }
 0x3d7   : > { %v2261_v59 = vpop.f32.mrf.mxu1 }
 0x3d8   : > { %1686 = vst [vmem:[%s2950_s23 + $0x30] sm:$0xff] %v1670_v22  ;;  %v1668_v62 = vadd.f32 %v2947_v30, %v1611_v51  ;;  %v1622_v0 = vadd.f32 %v2261_v59, %v2229_v49 }
 0x3d9   : > { %v1613_v1 = vpop.f32.mrf.mxu1 }
 0x3da   : > { %1684 = vst [vmem:[%s2950_s23 + $0x20] sm:$0xff] %v1668_v62  ;;  %v1671_v3 = vadd.f32 %v2947_v30, %v1622_v0  ;;  %v1614_v4 = vadd.f32 %v1613_v1, %v1468_v43 }
 0x3db   : > { %v2264_v61 = vpop.f32.mrf.mxu1 }
 0x3dc   : > { %1687 = vst [vmem:[%s2950_s23 + $0x38] sm:$0xff] %v1671_v3  ;;  %v1669_v5 = vadd.f32 %v2947_v30, %v1614_v4  ;;  %v1635_v7 = vadd.f32 %v2264_v61, %v2232_v45 }
 0x3dd   : > { %v1626_v56 = vpop.f32.mrf.mxu1 }
 0x3de   : > { %1685 = vst [vmem:[%s2950_s23 + $0x28] sm:$0xff] %v1669_v5  ;;  %v1674_v55 = vadd.f32 %v2947_v30, %v1635_v7  ;;  %v1627_v9 = vadd.f32 %v1626_v56, %v1481_v33 }
 0x3df   : > { %v2265_v57 = vpop.f32.mrf.mxu1 }
 0x3e0   : > { %1690 = vst [vmem:[%s2950_s23 + $0x50] sm:$0xff] %v1674_v55  ;;  %v1672_v11 = vadd.f32 %v2947_v30, %v1627_v9  ;;  %v1638_v54 = vadd.f32 %v2265_v57, %v2233_v47 }
 0x3e1   : > { %v1629_v15 = vpop.f32.mrf.mxu1 }
 0x3e2   : > { %1688 = vst [vmem:[%s2950_s23 + $0x40] sm:$0xff] %v1672_v11  ;;  %v1675_v10 = vadd.f32 %v2947_v30, %v1638_v54  ;;  %v1630_v19 = vadd.f32 %v1629_v15, %v1484_v35 }
 0x3e3   : > { %v2268_v63 = vpop.f32.mrf.mxu1 }
 0x3e4   : > { %1691 = vst [vmem:[%s2950_s23 + $0x58] sm:$0xff] %v1675_v10  ;;  %v1673_v60 = vadd.f32 %v2947_v30, %v1630_v19  ;;  %v1651_v20 = vadd.f32 %v2268_v63, %v2236_v8 }
 0x3e5   : > { %v1642_v23 = vpop.f32.mrf.mxu1 }
 0x3e6   : > { %1689 = vst [vmem:[%s2950_s23 + $0x48] sm:$0xff] %v1673_v60  ;;  %v1678_v2 = vadd.f32 %v2947_v30, %v1651_v20  ;;  %v1643_v26 = vadd.f32 %v1642_v23, %v1497_v13 }
 0x3e7   : > { %v2269_v16 = vpop.f32.mrf.mxu1 }
 0x3e8   : > { %1694 = vst [vmem:[%s2950_s23 + $0x70] sm:$0xff] %v1678_v2  ;;  %v1676_v28 = vadd.f32 %v2947_v30, %v1643_v26  ;;  %v1654_v21 = vadd.f32 %v2269_v16, %v2237_v58 }
 0x3e9   : > { %v1645_v12 = vpop.f32.mrf.mxu1 }
 0x3ea   : > { %1692 = vst [vmem:[%s2950_s23 + $0x60] sm:$0xff] %v1676_v28  ;;  %v1679_v29 = vadd.f32 %v2947_v30, %v1654_v21  ;;  %v1646_v25 = vadd.f32 %v1645_v12, %v1500_v14 }
 0x3ec   : > { %1695 = vst [vmem:[%s2950_s23 + $0x78] sm:$0xff] %v1679_v29  ;;  %v1677_v32 = vadd.f32 %v2947_v30, %v1646_v25 }
 0x3ee   : > { %1693 = vst [vmem:[%s2950_s23 + $0x68] sm:$0xff] %v1677_v32 }
 0x3ef   : > { %2486 = shalt.err (!%p2483_p0)
}
 0x3f0   : > { %s2487_s27 = scalar_lea.hbm %s2985_s14, 2048  ;;  %s2491_s24 = scalar_lea.hbm %s3043_s9, 6144 }
 0x3f1   : > { %p2488_p6 = scmp.ne.s32.totalorder %s2985_s14, %s2487_s27  ;;  %p2492_p1 = scmp.lt.s32.totalorder %s2985_s14, %s3043_s9 }
 0x3f2   : > { %p2493_p5 = scmp.lt.s32.totalorder %s2491_s24, %s2487_s27 }
 0x3f3   : > { %p2489_p9 = pnand %p2488_p6, %p3054_p12 }
 0x3f4   : > { %p2494_p3 = por %p2493_p5, %p2492_p1 }
 0x3f5   : > { %p2490_p13 = pneg %p2489_p9 }
 0x3f7   : > { %p2495_p10 = pnand %p2494_p3, %p2490_p13 }
 0x3f9   : > { %2498 = shalt.err (!%p2495_p10)
}
 0x3fa   : > { %s2550_s16 = smov 128   ;;  %s2551_s25 = smov 8  }
 0x3fb   : > { %2282 = dma.vmem_to_hbm [thread:$0]  (%p3054_p12), %s2987_s21, 2048, %s2985_s14, %s2994_s13, %s2550_s16, %s2550_s16, %s2551_s25  }
 0x3fc PF: > { %p2304_p2 = scmp.ge.s32.totalorder %s2541_s12, 2  ;;  %s1725_s29 = sand.u32 1, %s2529_s30  }
 0x3fd   : > { %p3055_p4 = scmp.ne.s32.totalorder %s3047_s20, 0  ;;  %s1726_s17 = scalar_lea.sflag [#allocation5], %s1725_s29 }
 0x3ff   : > { %p2295_p7 = pnand %p2304_p2, %p3055_p4 }
 0x401   : > { %p2296_p8 = pneg %p2295_p7 }
 0x403   : > { %2524 = dma.done.wait (%p2296_p8), %s1726_s17, 2048  }
 0x404   : > { %2526 = vsyncadd (%p2296_p8), %s1726_s17, 4294965248  ;;  %p21_p11 = scmp.ge.s32.totalorder %s2627_s15, 5   ;;  %s3056_s30 = smov %s2533_s10 }
 0x405   : > { %s3057_s10 = smov %s2537_s11  ;;  %s3058_s11 = smov %s2638_s18 }
 0x406   : > { %s3059_s12 = smov %s2627_s15  ;;  %23 = sbr.rel (!%p21_p11) target bundleno = 5 (0x5), region = 110 }
 0x40b   :  { %1731 = vsyncpa [#allocation4], 1 }
 0x40c   :  { %1733 = vsyncpa [#allocation4 + $0x1], 1 }
 0x40d   :  { %1734 = vsyncpa [#allocation7], 1 }
 0x40e   :  { %1735 = vsyncpa [#allocation5], 1 }
 0x40f   :  { %1737 = vsyncpa [#allocation5 + $0x1], 1 }

</bundles_post_ra>
